<compile_context>
chip_gen: v6e
topology: v6e:2x2x1
jax: 0.10.0
libtpu: 0.0.40
codegen_flags: <defaults>
</compile_context>

<pallas_src>
import functools
import math

import jax
import jax.numpy as jnp
from jax.experimental import pallas as pl
from jax.experimental.pallas import tpu as pltpu  # noqa: F401  (kept for parity / future tiling)

# ---- model config (small, consistent with the module) ----
BATCH = 2
SEQ = 8
HIDDEN = 32
N_HEADS = 4
HEAD_DIM = HIDDEN // N_HEADS
INTERMEDIATE = 64
LN_EPS = 1e-12


def _layer_norm(x, gamma, beta, eps):
    mean = jnp.mean(x, axis=-1, keepdims=True)
    var = jnp.mean((x - mean) ** 2, axis=-1, keepdims=True)
    return (x - mean) * jax.lax.rsqrt(var + eps) * gamma + beta


def _gelu(x):
    return x * 0.5 * (1.0 + jax.lax.erf(x * (1.0 / math.sqrt(2.0))))


def bert_layer_kernel(
    x_ref,                 # (B*S, H)
    wqkv_ref, bqkv_ref,    # (H, 3H), (1, 3H)  fused q|k|v
    wao_ref, bao_ref,      # (H, H), (1, H)    attention output dense
    g1_ref, b1_ref,        # (1, H)            attention LayerNorm
    wi_ref, bi_ref,        # (H, I), (1, I)    intermediate dense
    wo_ref, bo_ref,        # (I, H), (1, H)    output dense
    g2_ref, b2_ref,        # (1, H)            output LayerNorm
    out_ref,               # (B*S, H)
    probs_ref,             # (B, nH, S, S)
    *, batch, seq, hidden, n_heads, head_dim,
):
    x = x_ref[...]                                            # (B*S, H)

    # --- fused QKV projection: one MXU contraction, N = 3H lanes ---
    qkv = jnp.dot(x, wqkv_ref[...], preferred_element_type=jnp.float32) + bqkv_ref[...]
    q = qkv[:, 0 * hidden:1 * hidden]
    k = qkv[:, 1 * hidden:2 * hidden]
    v = qkv[:, 2 * hidden:3 * hidden]

    inv_sqrt_d = 1.0 / math.sqrt(head_dim)

    def heads(t):
        # (S, H) -> (nH, S, hd): stack along a new leading dim (no minor-dim reshape).
        return jnp.stack(
            [t[:, h * head_dim:(h + 1) * head_dim] for h in range(n_heads)], axis=0)

    ctx_rows = []
    prob_blocks = []
    for b in range(batch):                                    # static B=2 loop
        lo = b * seq
        qh = heads(q[lo:lo + seq, :])                         # (nH, S, hd)
        kh = heads(k[lo:lo + seq, :])
        vh = heads(v[lo:lo + seq, :])

        # Head-batched scores, contracting on the last axis (no explicit k.T).
        s = jnp.einsum('hqd,hkd->hqk', qh, kh,
                       preferred_element_type=jnp.float32) * inv_sqrt_d
        # TODO(synk): additive attention-mask path omitted (mask=None in this script)
        s = s - jnp.max(s, axis=-1, keepdims=True)
        e = jnp.exp(s)
        p = e / jnp.sum(e, axis=-1, keepdims=True)            # (nH, S, S) softmax
        prob_blocks.append(p)

        ctx_h = jnp.einsum('hqk,hkd->hqd', p, vh,
                           preferred_element_type=jnp.float32)  # (nH, S, hd)
        ctx_rows.append(
            jnp.concatenate([ctx_h[h] for h in range(n_heads)], axis=-1))  # (S, H)

    probs_ref[...] = jnp.stack(prob_blocks, axis=0)           # single probs store
    context = jnp.concatenate(ctx_rows, axis=0)               # (B*S, H)

    # --- self-output: dense + residual + LayerNorm ---
    attn = jnp.dot(context, wao_ref[...], preferred_element_type=jnp.float32) + bao_ref[...]
    attn = _layer_norm(attn + x, g1_ref[...], b1_ref[...], LN_EPS)

    # --- intermediate: dense + exact (erf) GELU ---
    inter = jnp.dot(attn, wi_ref[...], preferred_element_type=jnp.float32) + bi_ref[...]
    inter = _gelu(inter)

    # --- output: dense + residual + LayerNorm ---
    ff = jnp.dot(inter, wo_ref[...], preferred_element_type=jnp.float32) + bo_ref[...]
    out_ref[...] = _layer_norm(ff + attn, g2_ref[...], b2_ref[...], LN_EPS)


def bert_layer(x, params):
    """x: (B, S, H) float32. params: dict of weights in (in, out) layout + biases."""
    B, S, H = x.shape
    nH = N_HEADS
    hd = H // nH

    x2d = x.reshape(B * S, H)
    wqkv = jnp.concatenate([params["wq"], params["wk"], params["wv"]], axis=1)   # (H, 3H)
    bqkv = jnp.concatenate([params["bq"], params["bk"], params["bv"]], axis=1)   # (1, 3H)

    kernel = functools.partial(
        bert_layer_kernel, batch=B, seq=S, hidden=H, n_heads=nH, head_dim=hd)

    # No grid: single kernel invocation, every operand fully resident in VMEM.
    out2d, probs = pl.pallas_call(
        kernel,
        out_shape=(
            jax.ShapeDtypeStruct((B * S, H), jnp.float32),
            jax.ShapeDtypeStruct((B, nH, S, S), jnp.float32),
        ),
    )(
        x2d, wqkv, bqkv,
        params["wao"], params["bao"],
        params["g1"], params["b1"],
        params["wi"], params["bi"],
        params["wo"], params["bo"],
        params["g2"], params["b2"],
    )
    return out2d.reshape(B, S, H), probs


def bert_layer_ref(x, params):
    """Pure-JAX reference (same math as the PyTorch module, eval mode)."""
    B, S, H = x.shape
    nH, hd = N_HEADS, H // N_HEADS

    q = x @ params["wq"] + params["bq"]
    k = x @ params["wk"] + params["bk"]
    v = x @ params["wv"] + params["bv"]

    def split(t):
        return t.reshape(B, S, nH, hd).transpose(0, 2, 1, 3)   # (B, nH, S, hd)

    qh, kh, vh = split(q), split(k), split(v)
    scores = jnp.einsum('bhqd,bhkd->bhqk', qh, kh) / math.sqrt(hd)
    probs = jax.nn.softmax(scores, axis=-1)
    ctx = jnp.einsum('bhqk,bhkd->bhqd', probs, vh)
    ctx = ctx.transpose(0, 2, 1, 3).reshape(B, S, H)

    attn = ctx @ params["wao"] + params["bao"]
    attn = _layer_norm(attn + x, params["g1"], params["b1"], LN_EPS)
    inter = _gelu(attn @ params["wi"] + params["bi"])
    ff = inter @ params["wo"] + params["bo"]
    out = _layer_norm(ff + attn, params["g2"], params["b2"], LN_EPS)
    return out, probs


def init_params(key, hidden, intermediate):
    keys = jax.random.split(key, 8)
    scale = 0.02

    def w(k, shape):
        return scale * jax.random.normal(k, shape, dtype=jnp.float32)

    return {
        # linear weights stored as (in_features, out_features)
        "wq": w(keys[0], (hidden, hidden)),  "bq": jnp.zeros((1, hidden), jnp.float32),
        "wk": w(keys[1], (hidden, hidden)),  "bk": jnp.zeros((1, hidden), jnp.float32),
        "wv": w(keys[2], (hidden, hidden)),  "bv": jnp.zeros((1, hidden), jnp.float32),
        "wao": w(keys[3], (hidden, hidden)), "bao": jnp.zeros((1, hidden), jnp.float32),
        "g1": jnp.ones((1, hidden), jnp.float32), "b1": jnp.zeros((1, hidden), jnp.float32),
        "wi": w(keys[4], (hidden, intermediate)), "bi": jnp.zeros((1, intermediate), jnp.float32),
        "wo": w(keys[5], (intermediate, hidden)), "bo": jnp.zeros((1, hidden), jnp.float32),
        "g2": jnp.ones((1, hidden), jnp.float32), "b2": jnp.zeros((1, hidden), jnp.float32),
    }


if __name__ == "__main__":
    key = jax.random.PRNGKey(0)
    k_x, k_p = jax.random.split(key)
    x = jax.random.normal(k_x, (BATCH, SEQ, HIDDEN), dtype=jnp.float32)
    params = init_params(k_p, HIDDEN, INTERMEDIATE)

    layer_out, attn_probs = bert_layer(x, params)
    jax.block_until_ready(layer_out)
    jax.block_until_ready(attn_probs)

    assert layer_out.shape == (BATCH, SEQ, HIDDEN)
    assert attn_probs.shape == (BATCH, N_HEADS, SEQ, SEQ)

    # Correctness check against the pure-JAX reference (accurate f32 matmuls).
    with jax.default_matmul_precision("float32"):
        ref_out, ref_probs = bert_layer_ref(x, params)
    assert jnp.allclose(layer_out, ref_out, atol=2e-3, rtol=2e-3), (
        "max |diff| = %e" % float(jnp.max(jnp.abs(layer_out - ref_out))))
    assert jnp.allclose(attn_probs, ref_probs, atol=2e-3, rtol=2e-3), (
        "max |diff| = %e" % float(jnp.max(jnp.abs(attn_probs - ref_probs))))

    print("KERNEL_OK")
</pallas_src>

<mosaic_0001>
module attributes {stable_mosaic.version = 11 : i64} {
  func.func @bert_layer_kernel(%arg0: memref<16x32xf32, #tpu.memory_space<vmem>>, %arg1: memref<32x96xf32, #tpu.memory_space<vmem>>, %arg2: memref<1x96xf32, #tpu.memory_space<vmem>>, %arg3: memref<32x32xf32, #tpu.memory_space<vmem>>, %arg4: memref<1x32xf32, #tpu.memory_space<vmem>>, %arg5: memref<1x32xf32, #tpu.memory_space<vmem>>, %arg6: memref<1x32xf32, #tpu.memory_space<vmem>>, %arg7: memref<32x64xf32, #tpu.memory_space<vmem>>, %arg8: memref<1x64xf32, #tpu.memory_space<vmem>>, %arg9: memref<64x32xf32, #tpu.memory_space<vmem>>, %arg10: memref<1x32xf32, #tpu.memory_space<vmem>>, %arg11: memref<1x32xf32, #tpu.memory_space<vmem>>, %arg12: memref<1x32xf32, #tpu.memory_space<vmem>>, %arg13: memref<16x32xf32, #tpu.memory_space<vmem>>, %arg14: memref<2x4x8x8xf32, #tpu.memory_space<vmem>>) attributes {dimension_semantics = [], scalar_prefetch = 0 : i64, scratch_operands = 0 : i64, tpu.core_type = #tpu.core_type<tc>} {
    %c0 = arith.constant 0 : index
    %c0_0 = arith.constant 0 : index
    %0 = vector.load %arg0[%c0, %c0_0] : memref<16x32xf32, #tpu.memory_space<vmem>>, vector<16x32xf32>
    %c0_1 = arith.constant 0 : index
    %c0_2 = arith.constant 0 : index
    %1 = vector.load %arg1[%c0_1, %c0_2] : memref<32x96xf32, #tpu.memory_space<vmem>>, vector<32x96xf32>
    %cst = arith.constant dense<0.000000e+00> : vector<16x96xf32>
    %2 = tpu.matmul %0, %1, %cst {dimension_numbers = #tpu.dot_dimension_numbers<[1], [0], [0], [1], [0, 0, 1, 1], [], []>} : vector<16x32xf32>, vector<32x96xf32>, vector<16x96xf32> -> vector<16x96xf32>
    %c0_3 = arith.constant 0 : index
    %c0_4 = arith.constant 0 : index
    %3 = vector.load %arg2[%c0_3, %c0_4] : memref<1x96xf32, #tpu.memory_space<vmem>>, vector<1x96xf32>
    %4 = vector.broadcast %3 : vector<1x96xf32> to vector<16x96xf32>
    %5 = arith.addf %2, %4 : vector<16x96xf32>
    %6 = vector.extract_strided_slice %5 {offsets = [0, 0], sizes = [16, 32], strides = [1, 1]} : vector<16x96xf32> to vector<16x32xf32>
    %7 = vector.extract_strided_slice %5 {offsets = [0, 32], sizes = [16, 32], strides = [1, 1]} : vector<16x96xf32> to vector<16x32xf32>
    %8 = vector.extract_strided_slice %5 {offsets = [0, 64], sizes = [16, 32], strides = [1, 1]} : vector<16x96xf32> to vector<16x32xf32>
    %9 = vector.extract_strided_slice %6 {offsets = [0, 0], sizes = [8, 32], strides = [1, 1]} : vector<16x32xf32> to vector<8x32xf32>
    %10 = vector.extract_strided_slice %9 {offsets = [0, 0], sizes = [8, 8], strides = [1, 1]} : vector<8x32xf32> to vector<8x8xf32>
    %11 = vector.extract_strided_slice %9 {offsets = [0, 8], sizes = [8, 8], strides = [1, 1]} : vector<8x32xf32> to vector<8x8xf32>
    %12 = vector.extract_strided_slice %9 {offsets = [0, 16], sizes = [8, 8], strides = [1, 1]} : vector<8x32xf32> to vector<8x8xf32>
    %13 = vector.extract_strided_slice %9 {offsets = [0, 24], sizes = [8, 8], strides = [1, 1]} : vector<8x32xf32> to vector<8x8xf32>
    %14 = vector.shape_cast %10 : vector<8x8xf32> to vector<1x8x8xf32>
    %15 = vector.shape_cast %11 : vector<8x8xf32> to vector<1x8x8xf32>
    %16 = vector.shape_cast %12 : vector<8x8xf32> to vector<1x8x8xf32>
    %17 = vector.shape_cast %13 : vector<8x8xf32> to vector<1x8x8xf32>
    %18 = tpu.concatenate %14, %15, %16, %17 in 0 : vector<1x8x8xf32>, vector<1x8x8xf32>, vector<1x8x8xf32>, vector<1x8x8xf32> -> vector<4x8x8xf32>
    %19 = vector.extract_strided_slice %7 {offsets = [0, 0], sizes = [8, 32], strides = [1, 1]} : vector<16x32xf32> to vector<8x32xf32>
    %20 = vector.extract_strided_slice %19 {offsets = [0, 0], sizes = [8, 8], strides = [1, 1]} : vector<8x32xf32> to vector<8x8xf32>
    %21 = vector.extract_strided_slice %19 {offsets = [0, 8], sizes = [8, 8], strides = [1, 1]} : vector<8x32xf32> to vector<8x8xf32>
    %22 = vector.extract_strided_slice %19 {offsets = [0, 16], sizes = [8, 8], strides = [1, 1]} : vector<8x32xf32> to vector<8x8xf32>
    %23 = vector.extract_strided_slice %19 {offsets = [0, 24], sizes = [8, 8], strides = [1, 1]} : vector<8x32xf32> to vector<8x8xf32>
    %24 = vector.shape_cast %20 : vector<8x8xf32> to vector<1x8x8xf32>
    %25 = vector.shape_cast %21 : vector<8x8xf32> to vector<1x8x8xf32>
    %26 = vector.shape_cast %22 : vector<8x8xf32> to vector<1x8x8xf32>
    %27 = vector.shape_cast %23 : vector<8x8xf32> to vector<1x8x8xf32>
    %28 = tpu.concatenate %24, %25, %26, %27 in 0 : vector<1x8x8xf32>, vector<1x8x8xf32>, vector<1x8x8xf32>, vector<1x8x8xf32> -> vector<4x8x8xf32>
    %29 = vector.extract_strided_slice %8 {offsets = [0, 0], sizes = [8, 32], strides = [1, 1]} : vector<16x32xf32> to vector<8x32xf32>
    %30 = vector.extract_strided_slice %29 {offsets = [0, 0], sizes = [8, 8], strides = [1, 1]} : vector<8x32xf32> to vector<8x8xf32>
    %31 = vector.extract_strided_slice %29 {offsets = [0, 8], sizes = [8, 8], strides = [1, 1]} : vector<8x32xf32> to vector<8x8xf32>
    %32 = vector.extract_strided_slice %29 {offsets = [0, 16], sizes = [8, 8], strides = [1, 1]} : vector<8x32xf32> to vector<8x8xf32>
    %33 = vector.extract_strided_slice %29 {offsets = [0, 24], sizes = [8, 8], strides = [1, 1]} : vector<8x32xf32> to vector<8x8xf32>
    %34 = vector.shape_cast %30 : vector<8x8xf32> to vector<1x8x8xf32>
    %35 = vector.shape_cast %31 : vector<8x8xf32> to vector<1x8x8xf32>
    %36 = vector.shape_cast %32 : vector<8x8xf32> to vector<1x8x8xf32>
    %37 = vector.shape_cast %33 : vector<8x8xf32> to vector<1x8x8xf32>
    %38 = tpu.concatenate %34, %35, %36, %37 in 0 : vector<1x8x8xf32>, vector<1x8x8xf32>, vector<1x8x8xf32>, vector<1x8x8xf32> -> vector<4x8x8xf32>
    "tpu.trace_start"() <{level = 10 : i32, message = "hqd,hkd->hqk"}> : () -> ()
    %cst_5 = arith.constant dense<0.000000e+00> : vector<4x8x8xf32>
    %39 = tpu.matmul %18, %28, %cst_5 {dimension_numbers = #tpu.dot_dimension_numbers<[2], [2], [1], [1], [0, 0, 0, 1, 1, 1], [0], [0]>} : vector<4x8x8xf32>, vector<4x8x8xf32>, vector<4x8x8xf32> -> vector<4x8x8xf32>
    "tpu.trace_stop"() : () -> ()
    %cst_6 = arith.constant 0.353553385 : f32
    %40 = vector.broadcast %cst_6 : f32 to vector<4x8x8xf32>
    %41 = arith.mulf %39, %40 : vector<4x8x8xf32>
    %cst_7 = arith.constant dense<0xFF800000> : vector<4x8xf32>
    %42 = vector.multi_reduction <maximumf>, %41, %cst_7 [2] : vector<4x8x8xf32> to vector<4x8xf32>
    %43 = vector.shape_cast %42 : vector<4x8xf32> to vector<4x8x1xf32>
    %44 = vector.broadcast %43 : vector<4x8x1xf32> to vector<4x8x8xf32>
    %45 = arith.subf %41, %44 : vector<4x8x8xf32>
    %46 = math.exp %45 : vector<4x8x8xf32>
    %cst_8 = arith.constant dense<0.000000e+00> : vector<4x8xf32>
    %47 = vector.multi_reduction <add>, %46, %cst_8 [2] : vector<4x8x8xf32> to vector<4x8xf32>
    %48 = vector.shape_cast %47 : vector<4x8xf32> to vector<4x8x1xf32>
    %49 = vector.broadcast %48 : vector<4x8x1xf32> to vector<4x8x8xf32>
    %50 = arith.divf %46, %49 : vector<4x8x8xf32>
    "tpu.trace_start"() <{level = 10 : i32, message = "hqk,hkd->hqd"}> : () -> ()
    %cst_9 = arith.constant dense<0.000000e+00> : vector<4x8x8xf32>
    %51 = tpu.matmul %50, %38, %cst_9 {dimension_numbers = #tpu.dot_dimension_numbers<[2], [1], [1], [2], [0, 0, 0, 1, 1, 2], [0], [0]>} : vector<4x8x8xf32>, vector<4x8x8xf32>, vector<4x8x8xf32> -> vector<4x8x8xf32>
    "tpu.trace_stop"() : () -> ()
    %52 = vector.extract_strided_slice %51 {offsets = [0, 0, 0], sizes = [1, 8, 8], strides = [1, 1, 1]} : vector<4x8x8xf32> to vector<1x8x8xf32>
    %53 = vector.shape_cast %52 : vector<1x8x8xf32> to vector<8x8xf32>
    %54 = vector.extract_strided_slice %51 {offsets = [1, 0, 0], sizes = [1, 8, 8], strides = [1, 1, 1]} : vector<4x8x8xf32> to vector<1x8x8xf32>
    %55 = vector.shape_cast %54 : vector<1x8x8xf32> to vector<8x8xf32>
    %56 = vector.extract_strided_slice %51 {offsets = [2, 0, 0], sizes = [1, 8, 8], strides = [1, 1, 1]} : vector<4x8x8xf32> to vector<1x8x8xf32>
    %57 = vector.shape_cast %56 : vector<1x8x8xf32> to vector<8x8xf32>
    %58 = vector.extract_strided_slice %51 {offsets = [3, 0, 0], sizes = [1, 8, 8], strides = [1, 1, 1]} : vector<4x8x8xf32> to vector<1x8x8xf32>
    %59 = vector.shape_cast %58 : vector<1x8x8xf32> to vector<8x8xf32>
    %60 = tpu.concatenate %53, %55, %57, %59 in 1 : vector<8x8xf32>, vector<8x8xf32>, vector<8x8xf32>, vector<8x8xf32> -> vector<8x32xf32>
    %61 = vector.extract_strided_slice %6 {offsets = [8, 0], sizes = [8, 32], strides = [1, 1]} : vector<16x32xf32> to vector<8x32xf32>
    %62 = vector.extract_strided_slice %61 {offsets = [0, 0], sizes = [8, 8], strides = [1, 1]} : vector<8x32xf32> to vector<8x8xf32>
    %63 = vector.extract_strided_slice %61 {offsets = [0, 8], sizes = [8, 8], strides = [1, 1]} : vector<8x32xf32> to vector<8x8xf32>
    %64 = vector.extract_strided_slice %61 {offsets = [0, 16], sizes = [8, 8], strides = [1, 1]} : vector<8x32xf32> to vector<8x8xf32>
    %65 = vector.extract_strided_slice %61 {offsets = [0, 24], sizes = [8, 8], strides = [1, 1]} : vector<8x32xf32> to vector<8x8xf32>
    %66 = vector.shape_cast %62 : vector<8x8xf32> to vector<1x8x8xf32>
    %67 = vector.shape_cast %63 : vector<8x8xf32> to vector<1x8x8xf32>
    %68 = vector.shape_cast %64 : vector<8x8xf32> to vector<1x8x8xf32>
    %69 = vector.shape_cast %65 : vector<8x8xf32> to vector<1x8x8xf32>
    %70 = tpu.concatenate %66, %67, %68, %69 in 0 : vector<1x8x8xf32>, vector<1x8x8xf32>, vector<1x8x8xf32>, vector<1x8x8xf32> -> vector<4x8x8xf32>
    %71 = vector.extract_strided_slice %7 {offsets = [8, 0], sizes = [8, 32], strides = [1, 1]} : vector<16x32xf32> to vector<8x32xf32>
    %72 = vector.extract_strided_slice %71 {offsets = [0, 0], sizes = [8, 8], strides = [1, 1]} : vector<8x32xf32> to vector<8x8xf32>
    %73 = vector.extract_strided_slice %71 {offsets = [0, 8], sizes = [8, 8], strides = [1, 1]} : vector<8x32xf32> to vector<8x8xf32>
    %74 = vector.extract_strided_slice %71 {offsets = [0, 16], sizes = [8, 8], strides = [1, 1]} : vector<8x32xf32> to vector<8x8xf32>
    %75 = vector.extract_strided_slice %71 {offsets = [0, 24], sizes = [8, 8], strides = [1, 1]} : vector<8x32xf32> to vector<8x8xf32>
    %76 = vector.shape_cast %72 : vector<8x8xf32> to vector<1x8x8xf32>
    %77 = vector.shape_cast %73 : vector<8x8xf32> to vector<1x8x8xf32>
    %78 = vector.shape_cast %74 : vector<8x8xf32> to vector<1x8x8xf32>
    %79 = vector.shape_cast %75 : vector<8x8xf32> to vector<1x8x8xf32>
    %80 = tpu.concatenate %76, %77, %78, %79 in 0 : vector<1x8x8xf32>, vector<1x8x8xf32>, vector<1x8x8xf32>, vector<1x8x8xf32> -> vector<4x8x8xf32>
    %81 = vector.extract_strided_slice %8 {offsets = [8, 0], sizes = [8, 32], strides = [1, 1]} : vector<16x32xf32> to vector<8x32xf32>
    %82 = vector.extract_strided_slice %81 {offsets = [0, 0], sizes = [8, 8], strides = [1, 1]} : vector<8x32xf32> to vector<8x8xf32>
    %83 = vector.extract_strided_slice %81 {offsets = [0, 8], sizes = [8, 8], strides = [1, 1]} : vector<8x32xf32> to vector<8x8xf32>
    %84 = vector.extract_strided_slice %81 {offsets = [0, 16], sizes = [8, 8], strides = [1, 1]} : vector<8x32xf32> to vector<8x8xf32>
    %85 = vector.extract_strided_slice %81 {offsets = [0, 24], sizes = [8, 8], strides = [1, 1]} : vector<8x32xf32> to vector<8x8xf32>
    %86 = vector.shape_cast %82 : vector<8x8xf32> to vector<1x8x8xf32>
    %87 = vector.shape_cast %83 : vector<8x8xf32> to vector<1x8x8xf32>
    %88 = vector.shape_cast %84 : vector<8x8xf32> to vector<1x8x8xf32>
    %89 = vector.shape_cast %85 : vector<8x8xf32> to vector<1x8x8xf32>
    %90 = tpu.concatenate %86, %87, %88, %89 in 0 : vector<1x8x8xf32>, vector<1x8x8xf32>, vector<1x8x8xf32>, vector<1x8x8xf32> -> vector<4x8x8xf32>
    "tpu.trace_start"() <{level = 10 : i32, message = "hqd,hkd->hqk"}> : () -> ()
    %cst_10 = arith.constant dense<0.000000e+00> : vector<4x8x8xf32>
    %91 = tpu.matmul %70, %80, %cst_10 {dimension_numbers = #tpu.dot_dimension_numbers<[2], [2], [1], [1], [0, 0, 0, 1, 1, 1], [0], [0]>} : vector<4x8x8xf32>, vector<4x8x8xf32>, vector<4x8x8xf32> -> vector<4x8x8xf32>
    "tpu.trace_stop"() : () -> ()
    %cst_11 = arith.constant 0.353553385 : f32
    %92 = vector.broadcast %cst_11 : f32 to vector<4x8x8xf32>
    %93 = arith.mulf %91, %92 : vector<4x8x8xf32>
    %cst_12 = arith.constant dense<0xFF800000> : vector<4x8xf32>
    %94 = vector.multi_reduction <maximumf>, %93, %cst_12 [2] : vector<4x8x8xf32> to vector<4x8xf32>
    %95 = vector.shape_cast %94 : vector<4x8xf32> to vector<4x8x1xf32>
    %96 = vector.broadcast %95 : vector<4x8x1xf32> to vector<4x8x8xf32>
    %97 = arith.subf %93, %96 : vector<4x8x8xf32>
    %98 = math.exp %97 : vector<4x8x8xf32>
    %cst_13 = arith.constant dense<0.000000e+00> : vector<4x8xf32>
    %99 = vector.multi_reduction <add>, %98, %cst_13 [2] : vector<4x8x8xf32> to vector<4x8xf32>
    %100 = vector.shape_cast %99 : vector<4x8xf32> to vector<4x8x1xf32>
    %101 = vector.broadcast %100 : vector<4x8x1xf32> to vector<4x8x8xf32>
    %102 = arith.divf %98, %101 : vector<4x8x8xf32>
    "tpu.trace_start"() <{level = 10 : i32, message = "hqk,hkd->hqd"}> : () -> ()
    %cst_14 = arith.constant dense<0.000000e+00> : vector<4x8x8xf32>
    %103 = tpu.matmul %102, %90, %cst_14 {dimension_numbers = #tpu.dot_dimension_numbers<[2], [1], [1], [2], [0, 0, 0, 1, 1, 2], [0], [0]>} : vector<4x8x8xf32>, vector<4x8x8xf32>, vector<4x8x8xf32> -> vector<4x8x8xf32>
    "tpu.trace_stop"() : () -> ()
    %104 = vector.extract_strided_slice %103 {offsets = [0, 0, 0], sizes = [1, 8, 8], strides = [1, 1, 1]} : vector<4x8x8xf32> to vector<1x8x8xf32>
    %105 = vector.shape_cast %104 : vector<1x8x8xf32> to vector<8x8xf32>
    %106 = vector.extract_strided_slice %103 {offsets = [1, 0, 0], sizes = [1, 8, 8], strides = [1, 1, 1]} : vector<4x8x8xf32> to vector<1x8x8xf32>
    %107 = vector.shape_cast %106 : vector<1x8x8xf32> to vector<8x8xf32>
    %108 = vector.extract_strided_slice %103 {offsets = [2, 0, 0], sizes = [1, 8, 8], strides = [1, 1, 1]} : vector<4x8x8xf32> to vector<1x8x8xf32>
    %109 = vector.shape_cast %108 : vector<1x8x8xf32> to vector<8x8xf32>
    %110 = vector.extract_strided_slice %103 {offsets = [3, 0, 0], sizes = [1, 8, 8], strides = [1, 1, 1]} : vector<4x8x8xf32> to vector<1x8x8xf32>
    %111 = vector.shape_cast %110 : vector<1x8x8xf32> to vector<8x8xf32>
    %112 = tpu.concatenate %105, %107, %109, %111 in 1 : vector<8x8xf32>, vector<8x8xf32>, vector<8x8xf32>, vector<8x8xf32> -> vector<8x32xf32>
    %113 = vector.shape_cast %50 : vector<4x8x8xf32> to vector<1x4x8x8xf32>
    %114 = vector.shape_cast %102 : vector<4x8x8xf32> to vector<1x4x8x8xf32>
    %115 = tpu.concatenate %113, %114 in 0 : vector<1x4x8x8xf32>, vector<1x4x8x8xf32> -> vector<2x4x8x8xf32>
    %c0_15 = arith.constant 0 : index
    %c0_16 = arith.constant 0 : index
    %c0_17 = arith.constant 0 : index
    %c0_18 = arith.constant 0 : index
    %116 = vector.load %arg14[%c0_15, %c0_16, %c0_17, %c0_18] : memref<2x4x8x8xf32, #tpu.memory_space<vmem>>, vector<2x4x8x8xf32>
    tpu.vector_store %arg14[%c0_15, %c0_16, %c0_17, %c0_18], %115 {strides = array<i32>} : memref<2x4x8x8xf32, #tpu.memory_space<vmem>>, vector<2x4x8x8xf32>,
    %117 = tpu.concatenate %60, %112 in 0 : vector<8x32xf32>, vector<8x32xf32> -> vector<16x32xf32>
    %c0_19 = arith.constant 0 : index
    %c0_20 = arith.constant 0 : index
    %118 = vector.load %arg3[%c0_19, %c0_20] : memref<32x32xf32, #tpu.memory_space<vmem>>, vector<32x32xf32>
    %cst_21 = arith.constant dense<0.000000e+00> : vector<16x32xf32>
    %119 = tpu.matmul %117, %118, %cst_21 {dimension_numbers = #tpu.dot_dimension_numbers<[1], [0], [0], [1], [0, 0, 1, 1], [], []>} : vector<16x32xf32>, vector<32x32xf32>, vector<16x32xf32> -> vector<16x32xf32>
    %c0_22 = arith.constant 0 : index
    %c0_23 = arith.constant 0 : index
    %120 = vector.load %arg4[%c0_22, %c0_23] : memref<1x32xf32, #tpu.memory_space<vmem>>, vector<1x32xf32>
    %121 = vector.broadcast %120 : vector<1x32xf32> to vector<16x32xf32>
    %122 = arith.addf %119, %121 : vector<16x32xf32>
    %123 = arith.addf %122, %0 : vector<16x32xf32>
    %c0_24 = arith.constant 0 : index
    %c0_25 = arith.constant 0 : index
    %124 = vector.load %arg5[%c0_24, %c0_25] : memref<1x32xf32, #tpu.memory_space<vmem>>, vector<1x32xf32>
    %c0_26 = arith.constant 0 : index
    %c0_27 = arith.constant 0 : index
    %125 = vector.load %arg6[%c0_26, %c0_27] : memref<1x32xf32, #tpu.memory_space<vmem>>, vector<1x32xf32>
    %cst_28 = arith.constant dense<0.000000e+00> : vector<16xf32>
    %126 = vector.multi_reduction <add>, %123, %cst_28 [1] : vector<16x32xf32> to vector<16xf32>
    %127 = vector.shape_cast %126 : vector<16xf32> to vector<16x1xf32>
    %cst_29 = arith.constant 3.200000e+01 : f32
    %128 = vector.broadcast %cst_29 : f32 to vector<16x1xf32>
    %129 = arith.divf %127, %128 : vector<16x1xf32>
    %130 = vector.broadcast %129 : vector<16x1xf32> to vector<16x32xf32>
    %131 = arith.subf %123, %130 : vector<16x32xf32>
    %132 = arith.mulf %131, %131 : vector<16x32xf32>
    %cst_30 = arith.constant dense<0.000000e+00> : vector<16xf32>
    %133 = vector.multi_reduction <add>, %132, %cst_30 [1] : vector<16x32xf32> to vector<16xf32>
    %134 = vector.shape_cast %133 : vector<16xf32> to vector<16x1xf32>
    %cst_31 = arith.constant 3.200000e+01 : f32
    %135 = vector.broadcast %cst_31 : f32 to vector<16x1xf32>
    %136 = arith.divf %134, %135 : vector<16x1xf32>
    %137 = vector.broadcast %129 : vector<16x1xf32> to vector<16x32xf32>
    %138 = arith.subf %123, %137 : vector<16x32xf32>
    %cst_32 = arith.constant 9.99999996E-13 : f32
    %139 = vector.broadcast %cst_32 : f32 to vector<16x1xf32>
    %140 = arith.addf %136, %139 : vector<16x1xf32>
    %141 = math.rsqrt %140 : vector<16x1xf32>
    %142 = vector.broadcast %141 : vector<16x1xf32> to vector<16x32xf32>
    %143 = arith.mulf %138, %142 : vector<16x32xf32>
    %144 = vector.broadcast %124 : vector<1x32xf32> to vector<16x32xf32>
    %145 = arith.mulf %143, %144 : vector<16x32xf32>
    %146 = vector.broadcast %125 : vector<1x32xf32> to vector<16x32xf32>
    %147 = arith.addf %145, %146 : vector<16x32xf32>
    %c0_33 = arith.constant 0 : index
    %c0_34 = arith.constant 0 : index
    %148 = vector.load %arg7[%c0_33, %c0_34] : memref<32x64xf32, #tpu.memory_space<vmem>>, vector<32x64xf32>
    %cst_35 = arith.constant dense<0.000000e+00> : vector<16x64xf32>
    %149 = tpu.matmul %147, %148, %cst_35 {dimension_numbers = #tpu.dot_dimension_numbers<[1], [0], [0], [1], [0, 0, 1, 1], [], []>} : vector<16x32xf32>, vector<32x64xf32>, vector<16x64xf32> -> vector<16x64xf32>
    %c0_36 = arith.constant 0 : index
    %c0_37 = arith.constant 0 : index
    %150 = vector.load %arg8[%c0_36, %c0_37] : memref<1x64xf32, #tpu.memory_space<vmem>>, vector<1x64xf32>
    %151 = vector.broadcast %150 : vector<1x64xf32> to vector<16x64xf32>
    %152 = arith.addf %149, %151 : vector<16x64xf32>
    %cst_38 = arith.constant 5.000000e-01 : f32
    %153 = vector.broadcast %cst_38 : f32 to vector<16x64xf32>
    %154 = arith.mulf %152, %153 : vector<16x64xf32>
    %cst_39 = arith.constant 0.707106769 : f32
    %155 = vector.broadcast %cst_39 : f32 to vector<16x64xf32>
    %156 = arith.mulf %152, %155 : vector<16x64xf32>
    %157 = math.erf %156 : vector<16x64xf32>
    %cst_40 = arith.constant 1.000000e+00 : f32
    %158 = vector.broadcast %cst_40 : f32 to vector<16x64xf32>
    %159 = arith.addf %158, %157 : vector<16x64xf32>
    %160 = arith.mulf %154, %159 : vector<16x64xf32>
    %c0_41 = arith.constant 0 : index
    %c0_42 = arith.constant 0 : index
    %161 = vector.load %arg9[%c0_41, %c0_42] : memref<64x32xf32, #tpu.memory_space<vmem>>, vector<64x32xf32>
    %cst_43 = arith.constant dense<0.000000e+00> : vector<16x32xf32>
    %162 = tpu.matmul %160, %161, %cst_43 {dimension_numbers = #tpu.dot_dimension_numbers<[1], [0], [0], [1], [0, 0, 1, 1], [], []>} : vector<16x64xf32>, vector<64x32xf32>, vector<16x32xf32> -> vector<16x32xf32>
    %c0_44 = arith.constant 0 : index
    %c0_45 = arith.constant 0 : index
    %163 = vector.load %arg10[%c0_44, %c0_45] : memref<1x32xf32, #tpu.memory_space<vmem>>, vector<1x32xf32>
    %164 = vector.broadcast %163 : vector<1x32xf32> to vector<16x32xf32>
    %165 = arith.addf %162, %164 : vector<16x32xf32>
    %166 = arith.addf %165, %147 : vector<16x32xf32>
    %c0_46 = arith.constant 0 : index
    %c0_47 = arith.constant 0 : index
    %167 = vector.load %arg11[%c0_46, %c0_47] : memref<1x32xf32, #tpu.memory_space<vmem>>, vector<1x32xf32>
    %c0_48 = arith.constant 0 : index
    %c0_49 = arith.constant 0 : index
    %168 = vector.load %arg12[%c0_48, %c0_49] : memref<1x32xf32, #tpu.memory_space<vmem>>, vector<1x32xf32>
    %cst_50 = arith.constant dense<0.000000e+00> : vector<16xf32>
    %169 = vector.multi_reduction <add>, %166, %cst_50 [1] : vector<16x32xf32> to vector<16xf32>
    %170 = vector.shape_cast %169 : vector<16xf32> to vector<16x1xf32>
    %cst_51 = arith.constant 3.200000e+01 : f32
    %171 = vector.broadcast %cst_51 : f32 to vector<16x1xf32>
    %172 = arith.divf %170, %171 : vector<16x1xf32>
    %173 = vector.broadcast %172 : vector<16x1xf32> to vector<16x32xf32>
    %174 = arith.subf %166, %173 : vector<16x32xf32>
    %175 = arith.mulf %174, %174 : vector<16x32xf32>
    %cst_52 = arith.constant dense<0.000000e+00> : vector<16xf32>
    %176 = vector.multi_reduction <add>, %175, %cst_52 [1] : vector<16x32xf32> to vector<16xf32>
    %177 = vector.shape_cast %176 : vector<16xf32> to vector<16x1xf32>
    %cst_53 = arith.constant 3.200000e+01 : f32
    %178 = vector.broadcast %cst_53 : f32 to vector<16x1xf32>
    %179 = arith.divf %177, %178 : vector<16x1xf32>
    %180 = vector.broadcast %172 : vector<16x1xf32> to vector<16x32xf32>
    %181 = arith.subf %166, %180 : vector<16x32xf32>
    %cst_54 = arith.constant 9.99999996E-13 : f32
    %182 = vector.broadcast %cst_54 : f32 to vector<16x1xf32>
    %183 = arith.addf %179, %182 : vector<16x1xf32>
    %184 = math.rsqrt %183 : vector<16x1xf32>
    %185 = vector.broadcast %184 : vector<16x1xf32> to vector<16x32xf32>
    %186 = arith.mulf %181, %185 : vector<16x32xf32>
    %187 = vector.broadcast %167 : vector<1x32xf32> to vector<16x32xf32>
    %188 = arith.mulf %186, %187 : vector<16x32xf32>
    %189 = vector.broadcast %168 : vector<1x32xf32> to vector<16x32xf32>
    %190 = arith.addf %188, %189 : vector<16x32xf32>
    %c0_55 = arith.constant 0 : index
    %c0_56 = arith.constant 0 : index
    %191 = vector.load %arg13[%c0_55, %c0_56] : memref<16x32xf32, #tpu.memory_space<vmem>>, vector<16x32xf32>
    tpu.vector_store %arg13[%c0_55, %c0_56], %190 {strides = array<i32>} : memref<16x32xf32, #tpu.memory_space<vmem>>, vector<16x32xf32>,
    return
  }
}

</mosaic_0001>

<bundles_post_ra>
// kernel: tpu_custom_call.1
= control target key start
LH: loop header
LB: loop body
LE: loop exit
PB: predicated region body
PF: predicated region fallthrough
CT: control target
= control target key end

     0   :  { %20 = vsyncpa [#allocation3], 0  ;;  %s2673_s0 = inlined_call_operand.hbm [shape: f32[16,32], index: 0, kind: input, shape index: {}]   ;;  %s2674_s1 = inlined_call_operand.vmem [shape: f32[32,96], index: 1, kind: input, shape index: {}]   ;;  %s2675_s2 = inlined_call_operand.vmem [shape: f32[1,96], index: 2, kind: input, shape index: {}]   ;;  %s2676_s3 = inlined_call_operand.vmem [shape: f32[32,32], index: 3, kind: input, shape index: {}]   ;;  %s2677_s4 = inlined_call_operand.vmem [shape: f32[1,32], index: 4, kind: input, shape index: {}]   ;;  %s2678_s5 = inlined_call_operand.vmem [shape: f32[1,32], index: 5, kind: input, shape index: {}]   ;;  %s2679_s6 = inlined_call_operand.vmem [shape: f32[1,32], index: 6, kind: input, shape index: {}]   ;;  %s2680_s7 = inlined_call_operand.vmem [shape: f32[32,64], index: 7, kind: input, shape index: {}]   ;;  %s2681_s8 = inlined_call_operand.vmem [shape: f32[1,64], index: 8, kind: input, shape index: {}]   ;;  %s2682_s9 = inlined_call_operand.vmem [shape: f32[64,32], index: 9, kind: input, shape index: {}]   ;;  %s2683_s10 = inlined_call_operand.vmem [shape: f32[1,32], index: 10, kind: input, shape index: {}]   ;;  %s2684_s11 = inlined_call_operand.vmem [shape: f32[1,32], index: 11, kind: input, shape index: {}]   ;;  %s2685_s12 = inlined_call_operand.vmem [shape: f32[1,32], index: 12, kind: input, shape index: {}]   ;;  %s2686_s13 = inlined_call_operand.hbm [shape: f32[16,32], index: 13, kind: output, shape index: {0}]   ;;  %s2687_s14 = inlined_call_operand.hbm [shape: f32[2,4,8,8], index: 14, kind: output, shape index: {1}]  }
   0x1   :  { %21 = vsyncpa [#allocation4], 0 }
   0x2   :  { %22 = vsyncpa [#allocation7], 0  ;;  %s2299_s29 = smov [#allocation2]  }
   0x3   :  { %s28_s30 = sshll.u32 %s2299_s29, 4  ;;  %s29_s30 = int_to_ptr.vmem [resolvable:$true] %s28_s30 }
   0x4   :  { %s2241_s15 = scalar_lea.vmem %s29_s30, 256  ;;  %p2246_p1 = scmp.lt.s32.totalorder %s29_s30, %s29_s30 }
   0x5   :  { %p2242_p0 = scmp.ne.s32.totalorder %s29_s30, %s2241_s15  ;;  %p2247_p2 = scmp.lt.s32.totalorder %s2241_s15, %s2241_s15 }
   0x7   :  { %p2248_p3 = por %p2247_p2, %p2246_p1 }
   0x9   :  { %p2249_p4 = pnand %p2248_p3, %p2242_p0 }
   0xb   :  { %2252 = shalt.err (!%p2249_p4)
}
   0xc   :  { %s2300_s16 = smov 128   ;;  %s2301_s17 = smov 8  }
   0xd   :  { %34 = dma.hbm_to_vmem [thread:$0]  %s2673_s0, 256, %s29_s30, [#allocation3], %s2300_s16, %s2300_s16, %s2301_s17  }
   0xe   :  { %2293 = dma.done.wait [#allocation3], 256  }
   0xf   :  { %2294 = vsyncadd [#allocation3], 4294967040  ;;  %vm75_vm0 = vcmask 261120   ;;  %v67_v0 = vld [vmem:[%s2674_s1 + $0x18] sm:$0xff]  ;;  %v66_v1 = vld [vmem:[%s2674_s1 + $0x10] sm:$0xff]  ;;  %v2302_v6 = vmov 0.0  }
  0x10   :  { %2043 = vmatprep.subr.mxu1 %v67_v0  ;;  %v2400_v2 = vld [vmem:[#allocation2] sm:$0xff]  ;;  %v65_v3 = vld [vmem:[%s2674_s1 + $0x8] sm:$0xff]  ;;  %2064 = vmatprep.subr.mxu0 %v2302_v6  ;;  %vm2303_vm1 = vmmov 0   ;;  %s2305_s29 = smov 120   ;;  %s2306_s30 = smov 96   ;;  %vm166_vm2 = vcmask 64512  }
  0x11   :  { %2044 = vmatpush3.msra.mxu1 %v67_v0  ;;  %2051 = vmatprep.mubr.msk.f32.mxu1 %vm75_vm0, %v2400_v2  ;;  %v64_v4 = vld [vmem:[%s2674_s1] sm:$0xff]  ;;  %v2410_v5 = vld [vmem:[#allocation2 + $0x8] sm:$0xff]  ;;  %s2304_s1 = smov 104   ;;  %s2308_s15 = smov 64   ;;  %vm834_vm3 = vcmask 130048   ;;  %vm836_vm4 = vcmask 195584  }
  0x12   :  { %2045 = vmatprep.subr.mxu1 %v66_v1  ;;  %v1943_v7 = vld [vmem:[%s2675_s2] ss:$0 sm:$0xff]  ;;  %2066 = vmatprep.mubr.msk.f32.mxu0 %vm2303_vm1, %v2302_v6  ;;  %s2307_s2 = smov 112   ;;  %s2309_s18 = smov 16   ;;  %vm1780_vm5 = vcmask 523264  }
  0x13   :  { %2046 = vmatpush3.msra.mxu1 %v66_v1  ;;  %s2310_s19 = smov 24  }
  0x14   :  { %2047 = vmatprep.subr.mxu1 %v65_v3 }
  0x15   :  { %2048 = vmatpush3.msra.mxu1 %v65_v3 }
  0x16   :  { %2049 = vmatprep.subr.mxu1 %v64_v4 }
  0x17   :  { %2050 = vmatpush3.msra.mxu1 %v64_v4 }
  0x18   :  { %2052 = vmatmul.mubr.msk.f32.vlgmr.msra.gmra.mxu1 %vm75_vm0, %v2410_v5  ;;  %2054 = vmatprep.subr.mxu1 %v2302_v6 }
  0x19   :  { %2056 = vmatprep.mubr.msk.f32.mxu1 %vm2303_vm1, %v2302_v6 }
  0xd8   :  { %v2053_v8 = vpop.f32.mrf.mxu1 }
  0xd9   :  { %v2423_v9 = vadd.f32 %v2053_v8, %v1943_v7 }
  0xda   :  { %v148_v10 = vpop.f32.mrf.mxu1 }
  0xdb   :  { %v149_v11 = vadd.f32 %v1943_v7, %v148_v10 }
  0xdd   :  { %162 = vrot.lane.b32.xlu1 %v149_v11, %s2304_s1  ;;  %158 = vrot.lane.b32.xlu0 %v149_v11, %s2305_s29 }
  0xe1   :  { %164 = vrot.lane.b32.xlu1 %v149_v11, %s2306_s30  ;;  %160 = vrot.lane.b32.xlu0 %v149_v11, %s2307_s2 }
 0x14f   :  { %v163_v12 = vpop.permute.xlu1 %162  ;;  %v159_v13 = vpop.permute.xlu0 %158 }
 0x150   :  { %241 = vrot.lane.b32.xlu0 %v159_v13, %s2306_s30 }
 0x153   :  { %v165_v14 = vpop.permute.xlu1 %164  ;;  %v161_v15 = vpop.permute.xlu0 %160 }
 0x154   :  { %2055 = vmatpush3.xpose.msk.msra.mxu1 %vm166_vm2, %v165_v14  ;;  %393 = vrot.lane.b32.xlu0 %v163_v12, %s2306_s30 }
 0x155   :  { %317 = vrot.lane.b32.xlu1 %v161_v15, %s2306_s30  ;;  %2059 = vmatprep.subr.mxu1 %v2302_v6 }
 0x157   :  { %2057 = vmatmul.mubr.msk.f32.vlgmr.msra.gmra.mxu1 %vm166_vm2, %v149_v11 }
 0x158   :  { %2061 = vmatprep.mubr.msk.f32.mxu1 %vm2303_vm1, %v2302_v6 }
 0x1c2   :  { %v242_v16 = vpop.permute.xlu0 %241 }
 0x1c3   :  { %2060 = vmatpush3.xpose.msk.msra.mxu1 %vm166_vm2, %v242_v16 }
 0x1c4   :  { %2069 = vmatprep.subr.mxu1 %v2302_v6 }
 0x1c6   :  { %2062 = vmatmul.mubr.msk.f32.vlgmr.msra.gmra.mxu1 %vm166_vm2, %v159_v13  ;;  %v394_v17 = vpop.permute.xlu0 %393 }
 0x1c7   :  { %v318_v18 = vpop.permute.xlu1 %317  ;;  %2070 = vmatpush3.xpose.msk.msra.mxu1 %vm166_vm2, %v394_v17  ;;  %2071 = vmatprep.mubr.msk.f32.mxu1 %vm2303_vm1, %v2302_v6 }
 0x1c8   :  { %2065 = vmatpush3.xpose.msk.msra.mxu0 %vm166_vm2, %v318_v18  ;;  %2079 = vmatprep.subr.mxu1 %v2302_v6 }
 0x1c9   :  { %2074 = vmatprep.subr.mxu0 %v2302_v6 }
 0x1ca   :  { %2072 = vmatmul.mubr.msk.f32.vlgmr.msra.gmra.mxu1 %vm166_vm2, %v163_v12 }
 0x1cb   :  { %2067 = vmatmul.mubr.msk.f32.vlgmr.msra.gmra.mxu0 %vm166_vm2, %v161_v15  ;;  %2081 = vmatprep.mubr.msk.f32.mxu1 %vm2303_vm1, %v2302_v6 }
 0x1cc   :  { %2076 = vmatprep.mubr.msk.f32.mxu0 %vm2303_vm1, %v2302_v6 }
 0x217   :  { %v237_v19 = vpop.f32.mrf.mxu1 }
 0x218   :  { %v469_v20 = vmul.f32 0.35355338, %v237_v19 }
 0x219   :  { %v2058_v21 = vpop.f32.mrf.mxu1 }
 0x21a   :  { %v473_v22 = vsel %vm166_vm2, %v469_v20, -inf }
 0x21b   :  { %474 = vmax.xlane.f32.xlu1 %v473_v22 }
 0x286   :  { %v313_v23 = vpop.f32.mrf.mxu1 }
 0x287   :  { %v470_v24 = vmul.f32 0.35355338, %v313_v23 }
 0x288   :  { %v2063_v25 = vpop.f32.mrf.mxu1 }
 0x289   :  { %v476_v26 = vsel %vm166_vm2, %v470_v24, -inf }
 0x28a   :  { %477 = vmax.xlane.f32.xlu0 %v476_v26  ;;  %v465_v27 = vpop.f32.mrf.mxu1 }
 0x28b   :  { %v389_v28 = vpop.f32.mrf.mxu0  ;;  %v472_v29 = vmul.f32 0.35355338, %v465_v27 }
 0x28c   :  { %v471_v30 = vmul.f32 0.35355338, %v389_v28  ;;  %v2073_v31 = vpop.f32.mrf.mxu1 }
 0x28d   :  { %v2068_v32 = vpop.f32.mrf.mxu0  ;;  %v482_v33 = vsel %vm166_vm2, %v472_v29, -inf }
 0x28e   :  { %v479_v34 = vsel %vm166_vm2, %v471_v30, -inf  ;;  %483 = vmax.xlane.f32.xlu1 %v482_v33 }
 0x28f   :  { %480 = vmax.xlane.f32.xlu0 %v479_v34 }
 0x29f   :  { %841 = vrot.lane.b32.xlu1 %v2423_v9, %s2307_s2 }
 0x2a3   :  { %843 = vrot.lane.b32.xlu1 %v2423_v9, %s2304_s1 }
 0x2a4   :  { %v475_v35 = vpop.xlane.xlu1 %474 }
 0x2a5   :  { %839 = vrot.lane.b32.xlu0 %v2423_v9, %s2305_s29  ;;  %v485_v36 = vsub.f32 %v469_v20, %v475_v35 }
 0x2a7   :  { %517 = vrot.lane.b32.xlu1 %v149_v11, %s2308_s15  ;;  %v489_v37 = vmul.f32 1.442695, %v485_v36 }
 0x2a9   :  { %593 = vrot.lane.b32.xlu0 %v159_v13, %s2308_s15  ;;  %2189 = vpow2.f32 %v489_v37 }
 0x2ab   :  { %669 = vrot.lane.b32.xlu1 %v161_v15, %s2308_s15 }
 0x2af   :  { %745 = vrot.lane.b32.xlu1 %v163_v12, %s2308_s15 }
 0x2b6   :  { %v2190_v38 = vpop.eup %2189 }
 0x2b7   :  { %v497_v39 = vsel %vm166_vm2, %v2190_v38, 0.0 }
 0x2c8   :  { %498 = vadd.xlane.f32.xlu0 %v497_v39 }
 0x313   :  { %v478_v40 = vpop.xlane.xlu0 %477 }
 0x314   :  { %v486_v41 = vsub.f32 %v470_v24, %v478_v40 }
 0x316   :  { %v491_v42 = vmul.f32 1.442695, %v486_v41 }
 0x317   :  { %v484_v43 = vpop.xlane.xlu1 %483 }
 0x318   :  { %2191 = vpow2.f32 %v491_v42  ;;  %v488_v44 = vsub.f32 %v472_v29, %v484_v43  ;;  %v481_v45 = vpop.xlane.xlu0 %480 }
 0x319   :  { %v487_v46 = vsub.f32 %v471_v30, %v481_v45 }
 0x31a   :  { %v495_v47 = vmul.f32 1.442695, %v488_v44 }
 0x31b   :  { %v493_v48 = vmul.f32 1.442695, %v487_v46  ;;  %v2467_v49 = vpop.permute.xlu1 %841 }
 0x31c   :  { %v2469_v50 = vpop.permute.xlu0 %839 }
 0x31d   :  { %2193 = vpow2.f32 %v493_v48 }
 0x31e   :  { %2195 = vpow2.f32 %v495_v47 }
 0x31f   :  { %v2471_v51 = vpop.permute.xlu1 %843 }
 0x320   :  { %v594_v52 = vpop.permute.xlu0 %593 }
 0x321   :  { %2080 = vmatpush3.msra.mxu1 %v594_v52 }
 0x322   :  { %2089 = vmatprep.subr.mxu1 %v2302_v6 }
 0x323   :  { %v518_v53 = vpop.permute.xlu1 %517 }
 0x324   :  { %2075 = vmatpush3.msra.mxu0 %v518_v53 }
 0x325   :  { %v2192_v54 = vpop.eup %2191  ;;  %2084 = vmatprep.subr.mxu0 %v2302_v6 }
 0x326   :  { %v500_v55 = vsel %vm166_vm2, %v2192_v54, 0.0 }
 0x327   :  { %501 = vadd.xlane.f32.xlu1 %v500_v55  ;;  %v670_v63 = vpop.permute.xlu1 %669 }
 0x32a   :  { %v2194_v56 = vpop.eup %2193 }
 0x32b   :  { %v503_v57 = vsel %vm166_vm2, %v2194_v56, 0.0  ;;  %v2196_v58 = vpop.eup %2195  ;;  %v746_v0 = vpop.permute.xlu1 %745 }
 0x32c   :  { %504 = vadd.xlane.f32.xlu0 %v503_v57  ;;  %v506_v59 = vsel %vm166_vm2, %v2196_v58, 0.0 }
 0x330   :  { %507 = vadd.xlane.f32.xlu0 %v506_v59 }
 0x338   :  { %921 = vrot.lane.b32.xlu1 %v2469_v50, %s2306_s30 }
 0x33c   :  { %1073 = vrot.lane.b32.xlu1 %v2471_v51, %s2306_s30 }
 0x346   :  { %845 = vrot.lane.b32.xlu0 %v2423_v9, %s2306_s30 }
 0x34a   :  { %997 = vrot.lane.b32.xlu0 %v2467_v49, %s2306_s30 }
 0x351   :  { %v499_v60 = vpop.xlane.xlu0 %498 }
 0x352   :  { %2197 = vrcp.f32 %v499_v60 }
 0x35f   :  { %v2198_v61 = vpop.eup %2197 }
 0x360   :  { %v510_v62 = vmul.f32 %v2198_v61, %v2190_v38 }
 0x362   :  { %2077 = vmatmul.mubr.msk.f32.vlgmr.msra.gmra.mxu0 %vm166_vm2, %v510_v62  ;;  %1516 = vst.msk [vmem:[#allocation6] sm:$0xff] %vm166_vm2, %v510_v62 }
 0x363   :  { %2085 = vmatpush3.msra.mxu0 %v670_v63  ;;  %2086 = vmatprep.mubr.msk.f32.mxu0 %vm2303_vm1, %v2302_v6 }
 0x364   :  { %2094 = vmatprep.subr.mxu0 %v2302_v6 }
 0x3b0   :  { %v502_v1 = vpop.xlane.xlu1 %501 }
 0x3b1   :  { %2199 = vrcp.f32 %v502_v1 }
 0x3b4   :  { %v922_v14 = vpop.permute.xlu1 %921 }
 0x3b5   :  { %v505_v3 = vpop.xlane.xlu0 %504 }
 0x3b6   :  { %2201 = vrcp.f32 %v505_v3 }
 0x3b8   :  { %v1074_v17 = vpop.permute.xlu1 %1073 }
 0x3b9   :  { %v508_v4 = vpop.xlane.xlu0 %507 }
 0x3ba   :  { %2203 = vrcp.f32 %v508_v4 }
 0x3bd   :  { %v846_v11 = vpop.permute.xlu0 %845 }
 0x3be   :  { %v2200_v7 = vpop.eup %2199 }
 0x3bf   :  { %v512_v8 = vmul.f32 %v2200_v7, %v2192_v54 }
 0x3c1   :  { %2082 = vmatmul.mubr.msk.f32.vlgmr.msra.gmra.mxu1 %vm166_vm2, %v512_v8  ;;  %1517 = vst.msk [vmem:[#allocation6 + $0x8] sm:$0xff] %vm166_vm2, %v512_v8  ;;  %v998_v16 = vpop.permute.xlu0 %997 }
 0x3c2   :  { %2090 = vmatpush3.msra.mxu1 %v746_v0  ;;  %2091 = vmatprep.mubr.msk.f32.mxu1 %vm2303_vm1, %v2302_v6 }
 0x3c3   :  { %v2202_v10 = vpop.eup %2201  ;;  %2099 = vmatprep.subr.mxu1 %v2302_v6 }
 0x3c4   :  { %v514_v12 = vmul.f32 %v2202_v10, %v2194_v56 }
 0x3c6   :  { %2087 = vmatmul.mubr.msk.f32.vlgmr.msra.gmra.mxu0 %vm166_vm2, %v514_v12  ;;  %1518 = vst.msk [vmem:[#allocation6 + $0x10] sm:$0xff] %vm166_vm2, %v514_v12 }
 0x3c7   :  { %v2204_v13 = vpop.eup %2203  ;;  %2095 = vmatpush3.xpose.msk.msra.mxu0 %vm166_vm2, %v846_v11  ;;  %2096 = vmatprep.mubr.msk.f32.mxu0 %vm2303_vm1, %v2302_v6 }
 0x3c8   :  { %2104 = vmatprep.subr.mxu0 %v2302_v6  ;;  %v516_v15 = vmul.f32 %v2204_v13, %v2196_v58 }
 0x3ca   :  { %2092 = vmatmul.mubr.msk.f32.vlgmr.msra.gmra.mxu1 %vm166_vm2, %v516_v15  ;;  %1519 = vst.msk [vmem:[#allocation6 + $0x18] sm:$0xff] %vm166_vm2, %v516_v15  ;;  %2097 = vmatmul.mubr.msk.f32.vlgmr.msra.gmra.mxu0 %vm166_vm2, %v2423_v9 }
 0x3cb   :  { %2100 = vmatpush3.xpose.msk.msra.mxu1 %vm166_vm2, %v922_v14  ;;  %2105 = vmatpush3.xpose.msk.msra.mxu0 %vm166_vm2, %v998_v16 }
 0x3cc   :  { %2101 = vmatprep.mubr.msk.f32.mxu1 %vm2303_vm1, %v2302_v6  ;;  %2106 = vmatprep.mubr.msk.f32.mxu0 %vm2303_vm1, %v2302_v6 }
 0x3cd   :  { %2109 = vmatprep.subr.mxu1 %v2302_v6  ;;  %2114 = vmatprep.subr.mxu0 %v2302_v6 }
 0x3ce   :  { %2102 = vmatmul.mubr.msk.f32.vlgmr.msra.gmra.mxu1 %vm166_vm2, %v2469_v50  ;;  %2107 = vmatmul.mubr.msk.f32.vlgmr.msra.gmra.mxu0 %vm166_vm2, %v2467_v49 }
 0x3cf   :  { %2110 = vmatpush3.xpose.msk.msra.mxu1 %vm166_vm2, %v1074_v17  ;;  %2111 = vmatprep.mubr.msk.f32.mxu1 %vm2303_vm1, %v2302_v6 }
 0x3d0   :  { %2119 = vmatprep.subr.mxu1 %v2302_v6  ;;  %2116 = vmatprep.mubr.msk.f32.mxu0 %vm2303_vm1, %v2302_v6 }
 0x3d2   :  { %2112 = vmatmul.mubr.msk.f32.vlgmr.msra.gmra.mxu1 %vm166_vm2, %v2471_v51 }
 0x3d3   :  { %2121 = vmatprep.mubr.msk.f32.mxu1 %vm2303_vm1, %v2302_v6 }
 0x422   :  { %v2528_v18 = vpop.f32.mrf.mxu0 }
 0x424   :  { %v2078_v19 = vpop.f32.mrf.mxu0 }
 0x481   :  { %v2530_v20 = vpop.f32.mrf.mxu1 }
 0x483   :  { %v2083_v21 = vpop.f32.mrf.mxu1 }
 0x486   :  { %v741_v22 = vpop.f32.mrf.mxu0 }
 0x488   :  { %v2088_v23 = vpop.f32.mrf.mxu0 }
 0x489   :  { %v1527_v23 = vld [vmem:[%s2676_s3 + $0x18] sm:$0xff] }
 0x48a   :  { %v817_v24 = vpop.f32.mrf.mxu1  ;;  %v917_v25 = vpop.f32.mrf.mxu0 }
 0x48b   :  { %v1149_v26 = vmul.f32 0.35355338, %v917_v25  ;;  %v1525_v25 = vld [vmem:[%s2676_s3 + $0x8] sm:$0xff] }
 0x48c   :  { %v2093_v27 = vpop.f32.mrf.mxu1  ;;  %v2098_v28 = vpop.f32.mrf.mxu0 }
 0x48d   :  { %v1153_v29 = vsel %vm166_vm2, %v1149_v26, -inf }
 0x48e   :  { %v993_v30 = vpop.f32.mrf.mxu1  ;;  %1154 = vmax.xlane.f32.xlu0 %v1153_v29  ;;  %v1069_v31 = vpop.f32.mrf.mxu0 }
 0x48f   :  { %v1150_v32 = vmul.f32 0.35355338, %v993_v30  ;;  %v1151_v33 = vmul.f32 0.35355338, %v1069_v31 }
 0x490   :  { %v2103_v34 = vpop.f32.mrf.mxu1  ;;  %v2108_v35 = vpop.f32.mrf.mxu0 }
 0x491   :  { %v1156_v36 = vsel %vm166_vm2, %v1150_v32, -inf  ;;  %v1159_v37 = vsel %vm166_vm2, %v1151_v33, -inf }
 0x492   :  { %1157 = vmax.xlane.f32.xlu1 %v1156_v36  ;;  %v1145_v38 = vpop.f32.mrf.mxu1  ;;  %1160 = vmax.xlane.f32.xlu0 %v1159_v37 }
 0x493   :  { %v1152_v39 = vmul.f32 0.35355338, %v1145_v38 }
 0x494   :  { %v2113_v40 = vpop.f32.mrf.mxu1 }
 0x495   :  { %v1162_v41 = vsel %vm166_vm2, %v1152_v39, -inf  ;;  %v1970_v40 = vld [vmem:[%s2677_s4] ss:$0 sm:$0xff] }
 0x496   :  { %1163 = vmax.xlane.f32.xlu0 %v1162_v41 }
 0x4a3   :  { %1197 = vrot.lane.b32.xlu1 %v2423_v9, %s2308_s15 }
 0x517   :  { %v1155_v42 = vpop.xlane.xlu0 %1154 }
 0x518   :  { %v1165_v43 = vsub.f32 %v1149_v26, %v1155_v42 }
 0x51a   :  { %v1169_v44 = vmul.f32 1.442695, %v1165_v43 }
 0x51b   :  { %v1158_v45 = vpop.xlane.xlu1 %1157  ;;  %v1161_v46 = vpop.xlane.xlu0 %1160 }
 0x51c   :  { %2205 = vpow2.f32 %v1169_v44  ;;  %v1166_v47 = vsub.f32 %v1150_v32, %v1158_v45  ;;  %v1167_v48 = vsub.f32 %v1151_v33, %v1161_v46 }
 0x51e   :  { %v1171_v52 = vmul.f32 1.442695, %v1166_v47  ;;  %v1173_v53 = vmul.f32 1.442695, %v1167_v48 }
 0x51f   :  { %v1198_v54 = vpop.permute.xlu1 %1197  ;;  %v1164_v55 = vpop.xlane.xlu0 %1163 }
 0x520   :  { %2207 = vpow2.f32 %v1171_v52  ;;  %v1168_v56 = vsub.f32 %v1152_v39, %v1164_v55  ;;  %2115 = vmatpush3.msra.mxu0 %v1198_v54 }
 0x521   :  { %2209 = vpow2.f32 %v1173_v53  ;;  %2124 = vmatprep.subr.mxu0 %v2302_v6 }
 0x522   :  { %v1175_v57 = vmul.f32 1.442695, %v1168_v56 }
 0x524   :  { %2211 = vpow2.f32 %v1175_v57 }
 0x529   :  { %v2206_v9 = vpop.eup %2205 }
 0x52a   :  { %v1177_v58 = vsel %vm166_vm2, %v2206_v9, 0.0 }
 0x52b   :  { %1178 = vadd.xlane.f32.xlu1 %v1177_v58 }
 0x52d   :  { %v2208_v59 = vpop.eup %2207 }
 0x52e   :  { %v2210_v60 = vpop.eup %2209  ;;  %v1180_v61 = vsel %vm166_vm2, %v2208_v59, 0.0 }
 0x52f   :  { %1181 = vadd.xlane.f32.xlu0 %v1180_v61  ;;  %v1183_v62 = vsel %vm166_vm2, %v2210_v60, 0.0  ;;  %v1664_v61 = vld [vmem:[%s2680_s7 + $0x8] sm:$0xff] }
 0x530   :  { %1184 = vadd.xlane.f32.xlu1 %v1183_v62  ;;  %v1663_v62 = vld [vmem:[%s2680_s7] sm:$0xff] }
 0x531   :  { %v2212_v63 = vpop.eup %2211 }
 0x532   :  { %v1186_v0 = vsel %vm166_vm2, %v2212_v63, 0.0 }
 0x533   :  { %1187 = vadd.xlane.f32.xlu0 %v1186_v0 }
 0x541   :  { %1349 = vrot.lane.b32.xlu1 %v2467_v49, %s2308_s15 }
 0x545   :  { %1425 = vrot.lane.b32.xlu1 %v2471_v51, %s2308_s15 }
 0x549   :  { %826 = vrot.lane.b32.xlu1 %v741_v22, %s2309_s18  ;;  %1273 = vrot.lane.b32.xlu0 %v2469_v50, %s2308_s15 }
 0x54d   :  { %830 = vrot.lane.b32.xlu1 %v817_v24, %s2310_s19  ;;  %822 = vrot.lane.b32.xlu0 %v2530_v20, %s2301_s17  ;;  %v1526_v24 = vld [vmem:[%s2676_s3 + $0x10] sm:$0xff] }
 0x5b4   :  { %v1179_v1 = vpop.xlane.xlu1 %1178 }
 0x5b5   :  { %2213 = vrcp.f32 %v1179_v1 }
 0x5b8   :  { %v1182_v3 = vpop.xlane.xlu0 %1181 }
 0x5b9   :  { %v1185_v4 = vpop.xlane.xlu1 %1184  ;;  %2215 = vrcp.f32 %v1182_v3 }
 0x5ba   :  { %2217 = vrcp.f32 %v1185_v4 }
 0x5bc   :  { %v1188_v49 = vpop.xlane.xlu0 %1187 }
 0x5bd   :  { %v1350_v51 = vpop.permute.xlu1 %1349  ;;  %2219 = vrcp.f32 %v1188_v49 }
 0x5c0   :  { %v1274_v7 = vpop.permute.xlu0 %1273 }
 0x5c1   :  { %v1426_v8 = vpop.permute.xlu1 %1425  ;;  %2120 = vmatpush3.msra.mxu1 %v1274_v7  ;;  %v1973_v7 = vld [vmem:[%s2678_s5] ss:$0 sm:$0xff] }
 0x5c2   :  { %v2214_v10 = vpop.eup %2213  ;;  %2129 = vmatprep.subr.mxu1 %v2302_v6 }
 0x5c3   :  { %v1190_v50 = vmul.f32 %v2214_v10, %v2206_v9  ;;  %v1974_v10 = vld [vmem:[%s2679_s6] ss:$0 sm:$0xff] }
 0x5c4   :  { %v823_v11 = vpop.permute.xlu0 %822 }
 0x5c5   :  { %v827_v12 = vpop.permute.xlu1 %826  ;;  %2117 = vmatmul.mubr.msk.f32.vlgmr.msra.gmra.mxu0 %vm166_vm2, %v1190_v50  ;;  %1520 = vst.msk [vmem:[#allocation6 + $0x20] sm:$0xff] %vm166_vm2, %v1190_v50  ;;  %v833_v14 = vsel %vm166_vm2, %v2528_v18, %v823_v11 }
 0x5c6   :  { %v2216_v13 = vpop.eup %2215  ;;  %2125 = vmatpush3.msra.mxu0 %v1350_v51  ;;  %2126 = vmatprep.mubr.msk.f32.mxu0 %vm2303_vm1, %v2302_v6  ;;  %v835_v20 = vsel %vm834_vm3, %v833_v14, %v827_v12 }
 0x5c7   :  { %v2218_v15 = vpop.eup %2217  ;;  %v1192_v16 = vmul.f32 %v2216_v13, %v2208_v59  ;;  %2134 = vmatprep.subr.mxu0 %v1527_v23 }
 0x5c8   :  { %v1194_v17 = vmul.f32 %v2218_v15, %v2210_v60  ;;  %v1665_v60 = vld [vmem:[%s2680_s7 + $0x10] sm:$0xff] }
 0x5c9   :  { %v831_v19 = vpop.permute.xlu1 %830  ;;  %2122 = vmatmul.mubr.msk.f32.vlgmr.msra.gmra.mxu1 %vm166_vm2, %v1192_v16  ;;  %1521 = vst.msk [vmem:[#allocation6 + $0x28] sm:$0xff] %vm166_vm2, %v1192_v16  ;;  %v1772_v16 = vld [vmem:[%s2682_s9 + $0x38] sm:$0xff] }
 0x5ca   :  { %v2220_v21 = vpop.eup %2219  ;;  %v837_v22 = vsel %vm836_vm4, %v835_v20, %v831_v19  ;;  %2127 = vmatmul.mubr.msk.f32.vlgmr.msra.gmra.mxu0 %vm166_vm2, %v1194_v17  ;;  %1522 = vst.msk [vmem:[#allocation6 + $0x30] sm:$0xff] %vm166_vm2, %v1194_v17  ;;  %2130 = vmatpush3.msra.mxu1 %v1426_v8  ;;  %v1771_v17 = vld [vmem:[%s2682_s9 + $0x30] sm:$0xff]  ;;  %v1770_v19 = vld [vmem:[%s2682_s9 + $0x28] sm:$0xff]  ;;  %v1769_v20 = vld [vmem:[%s2682_s9 + $0x20] sm:$0xff] }
 0x5cb   :  { %2142 = vmatprep.mubr.msk.f32.mxu0 %vm75_vm0, %v837_v22  ;;  %2131 = vmatprep.mubr.msk.f32.mxu1 %vm2303_vm1, %v2302_v6  ;;  %v1196_v18 = vmul.f32 %v2220_v21, %v2212_v63  ;;  %v1524_v6 = vld [vmem:[%s2676_s3] sm:$0xff]  ;;  %v1768_v21 = vld [vmem:[%s2682_s9 + $0x18] sm:$0xff]  ;;  %v1767_v22 = vld [vmem:[%s2682_s9 + $0x10] sm:$0xff] }
 0x5cc   :  { %2135 = vmatpush3.msra.mxu0 %v1527_v23  ;;  %v1765_v23 = vld [vmem:[%s2682_s9] sm:$0xff] }
 0x5cd   :  { %2132 = vmatmul.mubr.msk.f32.vlgmr.msra.gmra.mxu1 %vm166_vm2, %v1196_v18  ;;  %1523 = vst.msk [vmem:[#allocation6 + $0x38] sm:$0xff] %vm166_vm2, %v1196_v18  ;;  %2136 = vmatprep.subr.mxu0 %v1526_v24  ;;  %v1766_v18 = vld [vmem:[%s2682_s9 + $0x8] sm:$0xff] }
 0x5ce   :  { %2137 = vmatpush3.msra.mxu0 %v1526_v24  ;;  %v1975_v24 = vld [vmem:[%s2681_s8] ss:$0 sm:$0xff] }
 0x5cf   :  { %2138 = vmatprep.subr.mxu0 %v1525_v25 }
 0x5d0   :  { %2139 = vmatpush3.msra.mxu0 %v1525_v25 }
 0x5d1   :  { %2140 = vmatprep.subr.mxu0 %v1524_v6 }
 0x5d2   :  { %2141 = vmatpush3.msra.mxu0 %v1524_v6 }
 0x5d3   :  { %2156 = vmatprep.subr.mxu0 %v1772_v16 }
 0x685   :  { %v1269_v26 = vpop.f32.mrf.mxu0 }
 0x687   :  { %v2118_v27 = vpop.f32.mrf.mxu0 }
 0x689   :  { %v1345_v28 = vpop.f32.mrf.mxu1 }
 0x68a   :  { %v1421_v29 = vpop.f32.mrf.mxu0  ;;  %1502 = vrot.lane.b32.xlu0 %v1345_v28, %s2301_s17 }
 0x68b   :  { %v2123_v30 = vpop.f32.mrf.mxu1 }
 0x68c   :  { %v2128_v31 = vpop.f32.mrf.mxu0 }
 0x68d   :  { %v1497_v32 = vpop.f32.mrf.mxu1 }
 0x68e   :  { %1506 = vrot.lane.b32.xlu0 %v1421_v29, %s2309_s18  ;;  %1510 = vrot.lane.b32.xlu1 %v1497_v32, %s2310_s19 }
 0x68f   :  { %v2133_v33 = vpop.f32.mrf.mxu1 }
 0x6fc   :  { %v1503_v34 = vpop.permute.xlu0 %1502 }
 0x6fd   :  { %v1513_v35 = vsel %vm166_vm2, %v1269_v26, %v1503_v34 }
 0x700   :  { %v1511_v36 = vpop.permute.xlu1 %1510  ;;  %v1507_v37 = vpop.permute.xlu0 %1506 }
 0x701   :  { %v1514_v38 = vsel %vm834_vm3, %v1513_v35, %v1507_v37 }
 0x702   :  { %v1515_v39 = vsel %vm836_vm4, %v1514_v38, %v1511_v36  ;;  %v1978_v38 = vld [vmem:[%s2683_s10] ss:$0 sm:$0xff]  ;;  %s2311_s10 = smov [#allocation6]  }
 0x703   :  { %2143 = vmatmul.mubr.msk.f32.vlgmr.msra.gmra.mxu0 %vm75_vm0, %v1515_v39  ;;  %s1927_s19 = sshll.u32 %s2311_s10, 4  ;;  %s1928_s19 = int_to_ptr.vmem [resolvable:$true] %s1927_s19 }
 0x704   :  { %2157 = vmatpush3.msra.mxu0 %v1772_v16  ;;  %s2253_s20 = scalar_lea.vmem %s1928_s19, 1024  ;;  %p2258_p6 = scmp.lt.s32.totalorder %s1928_s19, %s1928_s19 }
 0x705   :  { %2158 = vmatprep.subr.mxu0 %v1771_v17  ;;  %p2254_p5 = scmp.ne.s32.totalorder %s1928_s19, %s2253_s20  ;;  %p2259_p7 = scmp.lt.s32.totalorder %s2253_s20, %s2253_s20 }
 0x706   :  { %2159 = vmatpush3.msra.mxu0 %v1771_v17 }
 0x707   :  { %2160 = vmatprep.subr.mxu0 %v1770_v19  ;;  %p2260_p8 = por %p2259_p7, %p2258_p6 }
 0x708   :  { %2161 = vmatpush3.msra.mxu0 %v1770_v19 }
 0x709   :  { %2162 = vmatprep.subr.mxu0 %v1769_v20  ;;  %p2261_p9 = pnand %p2260_p8, %p2254_p5 }
 0x70a   :  { %2163 = vmatpush3.msra.mxu0 %v1769_v20 }
 0x70b   :  { %2164 = vmatprep.subr.mxu0 %v1768_v21 }
 0x70c   :  { %2165 = vmatpush3.msra.mxu0 %v1768_v21 }
 0x70d   :  { %2166 = vmatprep.subr.mxu0 %v1767_v22 }
 0x70e   :  { %2167 = vmatpush3.msra.mxu0 %v1767_v22 }
 0x70f   :  { %2168 = vmatprep.subr.mxu0 %v1766_v18 }
 0x710   :  { %2169 = vmatpush3.msra.mxu0 %v1766_v18 }
 0x711   :  { %2170 = vmatprep.subr.mxu0 %v1765_v23 }
 0x712   :  { %2171 = vmatpush3.msra.mxu0 %v1765_v23 }
 0x7c3   :  { %v2144_v41 = vpop.f32.mrf.mxu0 }
 0x7c4   :  { %v1613_v42 = vadd.f32 %v2144_v41, %v1970_v40 }
 0x7c5   :  { %v1607_v43 = vpop.f32.mrf.mxu0 }
 0x7c6   :  { %v1608_v44 = vadd.f32 %v1970_v40, %v1607_v43  ;;  %v1617_v45 = vadd.f32 %v1613_v42, %v2410_v5 }
 0x7c8   :  { %v1623_v46 = vsel %vm75_vm0, %v1617_v45, 0.0  ;;  %v1616_v47 = vadd.f32 %v1608_v44, %v2400_v2  ;;  %v1666_v2 = vld [vmem:[%s2680_s7 + $0x18] sm:$0xff] }
 0x7c9   :  { %1624 = vadd.xlane.f32.xlu1 %v1623_v46  ;;  %2145 = vmatprep.subr.mxu1 %v1666_v2 }
 0x7ca   :  { %v1620_v48 = vsel %vm75_vm0, %v1616_v47, 0.0  ;;  %2146 = vmatpush3.msra.mxu1 %v1666_v2 }
 0x7cb   :  { %1621 = vadd.xlane.f32.xlu0 %v1620_v48  ;;  %2147 = vmatprep.subr.mxu1 %v1665_v60 }
 0x7cc   :  { %2148 = vmatpush3.msra.mxu1 %v1665_v60 }
 0x7cd   :  { %2149 = vmatprep.subr.mxu1 %v1664_v61 }
 0x7ce   :  { %2150 = vmatpush3.msra.mxu1 %v1664_v61 }
 0x7cf   :  { %2151 = vmatprep.subr.mxu1 %v1663_v62 }
 0x7d0   :  { %2152 = vmatpush3.msra.mxu1 %v1663_v62 }
 0x852   :  { %v1625_v52 = vpop.xlane.xlu1 %1624 }
 0x853   :  { %v1628_v53 = vmul.f32 0.03125, %v1625_v52 }
 0x854   :  { %v1622_v54 = vpop.xlane.xlu0 %1621 }
 0x855   :  { %v1627_v55 = vmul.f32 0.03125, %v1622_v54  ;;  %v1630_v56 = vsub.f32 %v1617_v45, %v1628_v53 }
 0x857   :  { %v1629_v57 = vsub.f32 %v1616_v47, %v1627_v55  ;;  %v1632_v59 = vmul.f32 %v1630_v56, %v1630_v56 }
 0x859   :  { %v1631_v9 = vmul.f32 %v1629_v57, %v1629_v57  ;;  %v1636_v5 = vsel %vm75_vm0, %v1632_v59, 0.0 }
 0x85b   :  { %v1633_v58 = vsel %vm75_vm0, %v1631_v9, 0.0 }
 0x85c   :  { %1634 = vadd.xlane.f32.xlu0 %v1633_v58 }
 0x860   :  { %1637 = vadd.xlane.f32.xlu0 %v1636_v5 }
 0x8e5   :  { %v1635_v63 = vpop.xlane.xlu0 %1634 }
 0x8e6   :  { %v1639_v0 = vmul.f32 0.03125, %v1635_v63 }
 0x8e8   :  { %v1641_v1 = vadd.f32 1e-12, %v1639_v0 }
 0x8e9   :  { %v1638_v3 = vpop.xlane.xlu0 %1637 }
 0x8ea   :  { %2221 = vrsqrt.f32 %v1641_v1  ;;  %v1640_v4 = vmul.f32 0.03125, %v1638_v3 }
 0x8ec   :  { %v1642_v49 = vadd.f32 1e-12, %v1640_v4 }
 0x8ee   :  { %2223 = vrsqrt.f32 %v1642_v49 }
 0x8f7   :  { %v2222_v51 = vpop.eup %2221 }
 0x8f8   :  { %v1645_v8 = vmul.f32 %v2222_v51, %v1629_v57 }
 0x8fa   :  { %v1653_v50 = vmul.f32 %v1973_v7, %v1645_v8 }
 0x8fb   :  { %v2224_v11 = vpop.eup %2223 }
 0x8fc   :  { %v1646_v12 = vmul.f32 %v2224_v11, %v1630_v56  ;;  %v1661_v13 = vadd.f32 %v1974_v10, %v1653_v50 }
 0x8fe   :  { %v1654_v14 = vmul.f32 %v1973_v7, %v1646_v12  ;;  %2153 = vmatprep.mubr.msk.f32.mxu1 %vm75_vm0, %v1661_v13 }
 0x900   :  { %v1662_v15 = vadd.f32 %v1974_v10, %v1654_v14 }
 0x902   :  { %2154 = vmatmul.mubr.msk.f32.vlgmr.msra.gmra.mxu1 %vm75_vm0, %v1662_v15 }
 0x9c2   :  { %v2155_v25 = vpop.f32.mrf.mxu1 }
 0x9c3   :  { %v1752_v6 = vadd.f32 %v2155_v25, %v1975_v24 }
 0x9c4   :  { %v1746_v26 = vpop.f32.mrf.mxu1 }
 0x9c5   :  { %v1758_v27 = vmul.f32 0.70710677, %v1752_v6  ;;  %v1747_v28 = vadd.f32 %v1975_v24, %v1746_v26  ;;  %v1756_v35 = vmul.f32 0.5, %v1752_v6 }
 0x9c7   :  { %2225 = verf.f32 %v1758_v27  ;;  %v1757_v29 = vmul.f32 0.70710677, %v1747_v28  ;;  %v1755_v33 = vmul.f32 0.5, %v1747_v28 }
 0x9c9   :  { %2227 = verf.f32 %v1757_v29 }
 0x9d4   :  { %v2226_v30 = vpop.eup %2225 }
 0x9d5   :  { %v1762_v32 = vadd.f32 1.0, %v2226_v30 }
 0x9d6   :  { %v2228_v31 = vpop.eup %2227 }
 0x9d7   :  { %v1761_v34 = vadd.f32 1.0, %v2228_v31  ;;  %v1764_v37 = vmul.f32 %v1762_v32, %v1756_v35 }
 0x9d9   :  { %v1763_v36 = vmul.f32 %v1761_v34, %v1755_v33 }
 0x9db   :  { %2172 = vmatprep.mubr.msk.f32.mxu0 %vm1780_vm5, %v1763_v36 }
 0x9dc   :  { %2173 = vmatmul.mubr.msk.f32.vlgmr.msra.gmra.mxu0 %vm1780_vm5, %v1764_v37 }
 0xa9c   :  { %v2174_v39 = vpop.f32.mrf.mxu0 }
 0xa9d   :  { %v1859_v40 = vadd.f32 %v2174_v39, %v1978_v38 }
 0xa9e   :  { %v1853_v41 = vpop.f32.mrf.mxu0 }
 0xa9f   :  { %v1854_v42 = vadd.f32 %v1978_v38, %v1853_v41  ;;  %v1863_v43 = vadd.f32 %v1859_v40, %v1662_v15 }
 0xaa1   :  { %v1869_v44 = vsel %vm75_vm0, %v1863_v43, 0.0  ;;  %v1862_v45 = vadd.f32 %v1854_v42, %v1661_v13 }
 0xaa2   :  { %1870 = vadd.xlane.f32.xlu0 %v1869_v44 }
 0xaa3   :  { %v1866_v46 = vsel %vm75_vm0, %v1862_v45, 0.0 }
 0xaa4   :  { %1867 = vadd.xlane.f32.xlu1 %v1866_v46 }
 0xb2b   :  { %v1871_v47 = vpop.xlane.xlu0 %1870 }
 0xb2c   :  { %v1873_v48 = vmul.f32 0.03125, %v1871_v47 }
 0xb2d   :  { %v1868_v52 = vpop.xlane.xlu1 %1867 }
 0xb2e   :  { %v1875_v53 = vsub.f32 %v1863_v43, %v1873_v48  ;;  %v1872_v54 = vmul.f32 0.03125, %v1868_v52 }
 0xb30   :  { %v1874_v55 = vsub.f32 %v1862_v45, %v1872_v54  ;;  %v1877_v56 = vmul.f32 %v1875_v53, %v1875_v53 }
 0xb32   :  { %v1881_v57 = vsel %vm75_vm0, %v1877_v56, 0.0  ;;  %v1876_v9 = vmul.f32 %v1874_v55, %v1874_v55 }
 0xb33   :  { %1882 = vadd.xlane.f32.xlu0 %v1881_v57 }
 0xb34   :  { %v1878_v58 = vsel %vm75_vm0, %v1876_v9, 0.0 }
 0xb35   :  { %1879 = vadd.xlane.f32.xlu1 %v1878_v58 }
 0xb36   :  { %2264 = shalt.err (!%p2261_p9)
}
 0xb37   :  { %1933 = dma.vmem_to_hbm [thread:$0]  %s1928_s19, 1024, %s2687_s14, [#allocation7], %s2300_s16, %s2300_s16, %s2301_s17  }
 0xb38   :  { %v1981_v0 = vld [vmem:[%s2684_s11] ss:$0 sm:$0xff]  ;;  %s2312_s14 = smov [#allocation5]  }
 0xb39   :  { %v1982_v4 = vld [vmem:[%s2685_s12] ss:$0 sm:$0xff]  ;;  %s1915_s6 = sshll.u32 %s2312_s14, 4  ;;  %s1916_s6 = int_to_ptr.vmem [resolvable:$true] %s1915_s6 }
 0xb3a   :  { %s2273_s25 = scalar_lea.vmem %s1916_s6, 256  ;;  %p2278_p11 = scmp.lt.s32.totalorder %s1916_s6, %s1916_s6 }
 0xb3b   :  { %p2274_p10 = scmp.ne.s32.totalorder %s1916_s6, %s2273_s25  ;;  %p2279_p12 = scmp.lt.s32.totalorder %s2273_s25, %s2273_s25 }
 0xb3d   :  { %p2280_p13 = por %p2279_p12, %p2278_p11 }
 0xb3f   :  { %p2281_p0 = pnand %p2280_p13, %p2274_p10 }
 0xbbc   :  { %v1883_v59 = vpop.xlane.xlu0 %1882 }
 0xbbd   :  { %v1885_v5 = vmul.f32 0.03125, %v1883_v59 }
 0xbbe   :  { %v1880_v2 = vpop.xlane.xlu1 %1879 }
 0xbbf   :  { %v1887_v60 = vadd.f32 1e-12, %v1885_v5  ;;  %v1884_v61 = vmul.f32 0.03125, %v1880_v2 }
 0xbc1   :  { %2229 = vrsqrt.f32 %v1887_v60  ;;  %v1886_v62 = vadd.f32 1e-12, %v1884_v61 }
 0xbc3   :  { %2231 = vrsqrt.f32 %v1886_v62 }
 0xbce   :  { %v2230_v63 = vpop.eup %2229 }
 0xbcf   :  { %v1891_v1 = vmul.f32 %v2230_v63, %v1875_v53 }
 0xbd0   :  { %v2232_v3 = vpop.eup %2231 }
 0xbd1   :  { %v1890_v49 = vmul.f32 %v2232_v3, %v1874_v55  ;;  %v1899_v51 = vmul.f32 %v1981_v0, %v1891_v1 }
 0xbd3   :  { %v1898_v7 = vmul.f32 %v1981_v0, %v1890_v49  ;;  %v1907_v8 = vadd.f32 %v1982_v4, %v1899_v51 }
 0xbd5   :  { %v1906_v10 = vadd.f32 %v1982_v4, %v1898_v7  ;;  %1909 = vst.msk [vmem:[#allocation5 + $0x8] sm:$0xff] %vm75_vm0, %v1907_v8 }
 0xbd7   :  { %1908 = vst.msk [vmem:[#allocation5] sm:$0xff] %vm75_vm0, %v1906_v10 }
 0xbd8   :  { %2284 = shalt.err (!%p2281_p0)
}
 0xbd9   :  { %1921 = dma.vmem_to_hbm [thread:$0]  %s1916_s6, 256, %s2686_s13, [#allocation4], %s2300_s16, %s2300_s16, %s2301_s17  }
 0xbda   :  { %2295 = dma.done.wait [#allocation4], 256  }
 0xbdb   :  { %2296 = vsyncadd [#allocation4], 4294967040 }
 0xbdc   :  { %2297 = dma.done.wait [#allocation7], 1024  }
 0xbdd   :  { %2298 = vsyncadd [#allocation7], 4294966272 }
 0xbde   :  { %1940 = vsyncpa [#allocation3], 1 }
 0xbdf   :  { %1941 = vsyncpa [#allocation4], 1 }
 0xbe0   :  { %1942 = vsyncpa [#allocation7], 1 }

</bundles_post_ra>
